<compile_context>
chip_gen: v6e
topology: v6e:2x2x1
jax: 0.10.0
libtpu: 0.0.40
codegen_flags: <defaults>
</compile_context>

<pallas_src>
import jax
import jax.numpy as jnp
from jax.experimental import pallas as pl
from jax.experimental.pallas import tpu as pltpu

HIDDEN = 256


def _round_up(n, m):
    return ((n + m - 1) // m) * m


def _mlp_kernel(x_ref, w1_ref, wmid_ref, w7_ref, b16_ref, b7_ref, out_ref):
    """One batch tile of the full 7-layer DQN MLP.

    x_ref   : (TB, K_pad)   f32
    w1_ref  : (K_pad, 256)  bf16
    wmid_ref: (5, 256, 256) bf16   (fc2..fc6, stacked)
    w7_ref  : (256, A_pad)  bf16
    b16_ref : (6, 256)      f32    (fc1..fc6 biases, stacked)
    b7_ref  : (1, A_pad)    f32
    out_ref : (TB, A_pad)   f32
    """
    biases = b16_ref[...]                                   # (6, 256) f32

    # fc1 : bf16 matmul, f32 accumulate, f32 bias + ReLU
    h = jnp.dot(x_ref[...].astype(jnp.bfloat16), w1_ref[...],
                preferred_element_type=jnp.float32)
    h = jnp.maximum(h + biases[0], 0.0)

    # fc2..fc6 : static unrolled loop over the stacked weight slab
    for i in range(5):
        h = jnp.dot(h.astype(jnp.bfloat16), wmid_ref[i],
                    preferred_element_type=jnp.float32)
        h = jnp.maximum(h + biases[i + 1], 0.0)

    # fc7 : final linear (no activation)
    out_ref[...] = jnp.dot(h.astype(jnp.bfloat16), w7_ref[...],
                           preferred_element_type=jnp.float32) + b7_ref[...]


def init_params(state_size, action_size, key):
    """Deterministic synthetic init; shapes match DQNNetwork's nn.Linear layers.

    Weights are stored as (in_features, out_features) so that y = x @ W + b
    matches PyTorch's y = x @ W.T + b convention.
    """
    dims = [state_size] + [HIDDEN] * 6 + [action_size]
    params = {}
    for i in range(7):
        key, kw, kb = jax.random.split(key, 3)
        bound = 1.0 / jnp.sqrt(jnp.float32(dims[i]))
        params[f"w{i+1}"] = jax.random.uniform(
            kw, (dims[i], dims[i + 1]), jnp.float32, -bound, bound)
        params[f"b{i+1}"] = jax.random.uniform(
            kb, (dims[i + 1],), jnp.float32, -bound, bound)
    return params


def prepare_params(params, state_size, action_size):
    """One-time parameter prep (padding / stacking / bf16 cast), hoisted out of
    the per-call hot path."""
    k_pad = _round_up(state_size, 128)
    a_pad = _round_up(action_size, 128)

    w1 = jnp.zeros((k_pad, HIDDEN), jnp.bfloat16)
    w1 = w1.at[:state_size, :].set(params["w1"].astype(jnp.bfloat16))

    wmid = jnp.stack(
        [params[f"w{i}"].astype(jnp.bfloat16) for i in range(2, 7)])  # (5,256,256)

    w7 = jnp.zeros((HIDDEN, a_pad), jnp.bfloat16)
    w7 = w7.at[:, :action_size].set(params["w7"].astype(jnp.bfloat16))

    b16 = jnp.stack([params[f"b{i}"] for i in range(1, 7)]).astype(jnp.float32)

    b7 = jnp.zeros((1, a_pad), jnp.float32)
    b7 = b7.at[0, :action_size].set(params["b7"])

    return {
        "w1": w1, "wmid": wmid, "w7": w7, "b16": b16, "b7": b7,
        "state_size": state_size, "action_size": action_size,
        "k_pad": k_pad, "a_pad": a_pad,
    }


def dqn_forward(x, prep):
    """DQN forward pass via one pallas_call, gridded over the batch axis."""
    B, state_size = x.shape
    assert state_size == prep["state_size"]
    k_pad, a_pad = prep["k_pad"], prep["a_pad"]
    action_size = prep["action_size"]

    # Batch tile: 256 rows = one full MXU pass on v6e/v7x (2x128 on v5e);
    # small batches just use the 8-rounded batch as a single tile.
    b_min = _round_up(B, 8)
    tb = 256 if b_min >= 256 else b_min
    b_pad = _round_up(b_min, tb)

    # Only the per-call input is touched in the hot path (one cheap pad).
    x_p = jnp.pad(x.astype(jnp.float32),
                  ((0, b_pad - B), (0, k_pad - state_size)))

    out = pl.pallas_call(
        _mlp_kernel,
        out_shape=jax.ShapeDtypeStruct((b_pad, a_pad), jnp.float32),
        grid=(b_pad // tb,),
        in_specs=[
            pl.BlockSpec((tb, k_pad), lambda i: (i, 0)),            # x tile
            pl.BlockSpec((k_pad, HIDDEN), lambda i: (0, 0)),        # w1 (resident)
            pl.BlockSpec((5, HIDDEN, HIDDEN), lambda i: (0, 0, 0)),  # w2..w6
            pl.BlockSpec((HIDDEN, a_pad), lambda i: (0, 0)),        # w7
            pl.BlockSpec((6, HIDDEN), lambda i: (0, 0)),            # b1..b6
            pl.BlockSpec((1, a_pad), lambda i: (0, 0)),             # b7
        ],
        out_specs=pl.BlockSpec((tb, a_pad), lambda i: (i, 0)),
        compiler_params=pltpu.CompilerParams(
            dimension_semantics=("parallel",)),
    )(x_p, prep["w1"], prep["wmid"], prep["w7"], prep["b16"], prep["b7"])

    return out[:B, :action_size]


def reference_forward(x, params):
    """Plain-JAX f32 reference mirroring the PyTorch forward."""
    h = x
    for i in range(1, 7):
        h = jnp.maximum(h @ params[f"w{i}"] + params[f"b{i}"], 0.0)
    return h @ params["w7"] + params["b7"]


def reference_forward_mixed(x, params):
    """Reference with the kernel's precision recipe: bf16 matmul operands,
    f32 accumulation, f32 bias/ReLU."""
    h = x
    for i in range(1, 7):
        h = jnp.dot(h.astype(jnp.bfloat16),
                    params[f"w{i}"].astype(jnp.bfloat16),
                    preferred_element_type=jnp.float32)
        h = jnp.maximum(h + params[f"b{i}"], 0.0)
    return jnp.dot(h.astype(jnp.bfloat16),
                   params["w7"].astype(jnp.bfloat16),
                   preferred_element_type=jnp.float32) + params["b7"]


if __name__ == "__main__":
    key = jax.random.PRNGKey(0)
    state_size, action_size, batch = 16, 4, 8

    key, kp, kx = jax.random.split(key, 3)
    params = init_params(state_size, action_size, kp)
    x = jax.random.normal(kx, (batch, state_size), jnp.float32)

    prep = prepare_params(params, state_size, action_size)  # one-time, not per call

    out = jax.block_until_ready(dqn_forward(x, prep))

    ref_mixed = reference_forward_mixed(x, params)  # same precision recipe
    ref_f32 = reference_forward(x, params)          # pure f32 sanity check

    assert out.shape == (batch, action_size), out.shape
    assert jnp.allclose(out, ref_mixed, atol=1e-2, rtol=1e-2), \
        float(jnp.max(jnp.abs(out - ref_mixed)))
    assert jnp.allclose(out, ref_f32, atol=5e-2, rtol=5e-2), \
        float(jnp.max(jnp.abs(out - ref_f32)))
    print("KERNEL_OK")
</pallas_src>

<mosaic_0001>
module attributes {stable_mosaic.version = 11 : i64} {
  func.func @_mlp_kernel(%arg0: i32, %arg1: memref<8x128xf32, #tpu.memory_space<vmem>>, %arg2: memref<128x256xbf16, #tpu.memory_space<vmem>>, %arg3: memref<5x256x256xbf16, #tpu.memory_space<vmem>>, %arg4: memref<256x128xbf16, #tpu.memory_space<vmem>>, %arg5: memref<6x256xf32, #tpu.memory_space<vmem>>, %arg6: memref<1x128xf32, #tpu.memory_space<vmem>>, %arg7: memref<8x128xf32, #tpu.memory_space<vmem>>) attributes {dimension_semantics = [#tpu.dimension_semantics<parallel>], iteration_bounds = array<i64: 1>, scalar_prefetch = 0 : i64, scratch_operands = 0 : i64, tpu.core_type = #tpu.core_type<tc>, window_params = [{transform_indices = @transform_0, window_bounds = array<i64: 8, 128>}, {pipeline_mode = #tpu.pipeline_mode<synchronous>, transform_indices = @transform_1, window_bounds = array<i64: 128, 256>}, {pipeline_mode = #tpu.pipeline_mode<synchronous>, transform_indices = @transform_2, window_bounds = array<i64: 5, 256, 256>}, {pipeline_mode = #tpu.pipeline_mode<synchronous>, transform_indices = @transform_3, window_bounds = array<i64: 256, 128>}, {pipeline_mode = #tpu.pipeline_mode<synchronous>, transform_indices = @transform_4, window_bounds = array<i64: 6, 256>}, {pipeline_mode = #tpu.pipeline_mode<synchronous>, transform_indices = @transform_5, window_bounds = array<i64: 1, 128>}, {transform_indices = @transform_6, window_bounds = array<i64: 8, 128>}]} {
    %c0 = arith.constant 0 : index
    %c0_0 = arith.constant 0 : index
    %0 = vector.load %arg5[%c0, %c0_0] : memref<6x256xf32, #tpu.memory_space<vmem>>, vector<6x256xf32>
    %c0_1 = arith.constant 0 : index
    %c0_2 = arith.constant 0 : index
    %1 = vector.load %arg1[%c0_1, %c0_2] : memref<8x128xf32, #tpu.memory_space<vmem>>, vector<8x128xf32>
    %2 = arith.truncf %1 : vector<8x128xf32> to vector<8x128xbf16>
    %c0_3 = arith.constant 0 : index
    %c0_4 = arith.constant 0 : index
    %3 = vector.load %arg2[%c0_3, %c0_4] : memref<128x256xbf16, #tpu.memory_space<vmem>>, vector<128x256xbf16>
    %cst = arith.constant dense<0.000000e+00> : vector<8x256xf32>
    %4 = tpu.matmul %2, %3, %cst {dimension_numbers = #tpu.dot_dimension_numbers<[1], [0], [0], [1], [0, 0, 1, 1], [], []>} : vector<8x128xbf16>, vector<128x256xbf16>, vector<8x256xf32> -> vector<8x256xf32>
    %5 = vector.extract_strided_slice %0 {offsets = [0, 0], sizes = [1, 256], strides = [1, 1]} : vector<6x256xf32> to vector<1x256xf32>
    %6 = vector.shape_cast %5 : vector<1x256xf32> to vector<256xf32>
    %7 = vector.shape_cast %6 : vector<256xf32> to vector<1x256xf32>
    %8 = vector.broadcast %7 : vector<1x256xf32> to vector<8x256xf32>
    %9 = arith.addf %4, %8 : vector<8x256xf32>
    %cst_5 = arith.constant 0.000000e+00 : f32
    %10 = vector.broadcast %cst_5 : f32 to vector<8x256xf32>
    %11 = arith.maximumf %9, %10 : vector<8x256xf32>
    %12 = arith.truncf %11 : vector<8x256xf32> to vector<8x256xbf16>
    %c0_6 = arith.constant 0 : index
    %c0_7 = arith.constant 0 : index
    %c0_8 = arith.constant 0 : index
    %13 = vector.load %arg3[%c0_6, %c0_7, %c0_8] : memref<5x256x256xbf16, #tpu.memory_space<vmem>>, vector<1x256x256xbf16>
    %14 = vector.shape_cast %13 : vector<1x256x256xbf16> to vector<256x256xbf16>
    %cst_9 = arith.constant dense<0.000000e+00> : vector<8x256xf32>
    %15 = tpu.matmul %12, %14, %cst_9 {dimension_numbers = #tpu.dot_dimension_numbers<[1], [0], [0], [1], [0, 0, 1, 1], [], []>} : vector<8x256xbf16>, vector<256x256xbf16>, vector<8x256xf32> -> vector<8x256xf32>
    %16 = vector.extract_strided_slice %0 {offsets = [1, 0], sizes = [1, 256], strides = [1, 1]} : vector<6x256xf32> to vector<1x256xf32>
    %17 = vector.shape_cast %16 : vector<1x256xf32> to vector<256xf32>
    %18 = vector.shape_cast %17 : vector<256xf32> to vector<1x256xf32>
    %19 = vector.broadcast %18 : vector<1x256xf32> to vector<8x256xf32>
    %20 = arith.addf %15, %19 : vector<8x256xf32>
    %cst_10 = arith.constant 0.000000e+00 : f32
    %21 = vector.broadcast %cst_10 : f32 to vector<8x256xf32>
    %22 = arith.maximumf %20, %21 : vector<8x256xf32>
    %23 = arith.truncf %22 : vector<8x256xf32> to vector<8x256xbf16>
    %c1 = arith.constant 1 : index
    %c0_11 = arith.constant 0 : index
    %c0_12 = arith.constant 0 : index
    %24 = vector.load %arg3[%c1, %c0_11, %c0_12] : memref<5x256x256xbf16, #tpu.memory_space<vmem>>, vector<1x256x256xbf16>
    %25 = vector.shape_cast %24 : vector<1x256x256xbf16> to vector<256x256xbf16>
    %cst_13 = arith.constant dense<0.000000e+00> : vector<8x256xf32>
    %26 = tpu.matmul %23, %25, %cst_13 {dimension_numbers = #tpu.dot_dimension_numbers<[1], [0], [0], [1], [0, 0, 1, 1], [], []>} : vector<8x256xbf16>, vector<256x256xbf16>, vector<8x256xf32> -> vector<8x256xf32>
    %27 = vector.extract_strided_slice %0 {offsets = [2, 0], sizes = [1, 256], strides = [1, 1]} : vector<6x256xf32> to vector<1x256xf32>
    %28 = vector.shape_cast %27 : vector<1x256xf32> to vector<256xf32>
    %29 = vector.shape_cast %28 : vector<256xf32> to vector<1x256xf32>
    %30 = vector.broadcast %29 : vector<1x256xf32> to vector<8x256xf32>
    %31 = arith.addf %26, %30 : vector<8x256xf32>
    %cst_14 = arith.constant 0.000000e+00 : f32
    %32 = vector.broadcast %cst_14 : f32 to vector<8x256xf32>
    %33 = arith.maximumf %31, %32 : vector<8x256xf32>
    %34 = arith.truncf %33 : vector<8x256xf32> to vector<8x256xbf16>
    %c2 = arith.constant 2 : index
    %c0_15 = arith.constant 0 : index
    %c0_16 = arith.constant 0 : index
    %35 = vector.load %arg3[%c2, %c0_15, %c0_16] : memref<5x256x256xbf16, #tpu.memory_space<vmem>>, vector<1x256x256xbf16>
    %36 = vector.shape_cast %35 : vector<1x256x256xbf16> to vector<256x256xbf16>
    %cst_17 = arith.constant dense<0.000000e+00> : vector<8x256xf32>
    %37 = tpu.matmul %34, %36, %cst_17 {dimension_numbers = #tpu.dot_dimension_numbers<[1], [0], [0], [1], [0, 0, 1, 1], [], []>} : vector<8x256xbf16>, vector<256x256xbf16>, vector<8x256xf32> -> vector<8x256xf32>
    %38 = vector.extract_strided_slice %0 {offsets = [3, 0], sizes = [1, 256], strides = [1, 1]} : vector<6x256xf32> to vector<1x256xf32>
    %39 = vector.shape_cast %38 : vector<1x256xf32> to vector<256xf32>
    %40 = vector.shape_cast %39 : vector<256xf32> to vector<1x256xf32>
    %41 = vector.broadcast %40 : vector<1x256xf32> to vector<8x256xf32>
    %42 = arith.addf %37, %41 : vector<8x256xf32>
    %cst_18 = arith.constant 0.000000e+00 : f32
    %43 = vector.broadcast %cst_18 : f32 to vector<8x256xf32>
    %44 = arith.maximumf %42, %43 : vector<8x256xf32>
    %45 = arith.truncf %44 : vector<8x256xf32> to vector<8x256xbf16>
    %c3 = arith.constant 3 : index
    %c0_19 = arith.constant 0 : index
    %c0_20 = arith.constant 0 : index
    %46 = vector.load %arg3[%c3, %c0_19, %c0_20] : memref<5x256x256xbf16, #tpu.memory_space<vmem>>, vector<1x256x256xbf16>
    %47 = vector.shape_cast %46 : vector<1x256x256xbf16> to vector<256x256xbf16>
    %cst_21 = arith.constant dense<0.000000e+00> : vector<8x256xf32>
    %48 = tpu.matmul %45, %47, %cst_21 {dimension_numbers = #tpu.dot_dimension_numbers<[1], [0], [0], [1], [0, 0, 1, 1], [], []>} : vector<8x256xbf16>, vector<256x256xbf16>, vector<8x256xf32> -> vector<8x256xf32>
    %49 = vector.extract_strided_slice %0 {offsets = [4, 0], sizes = [1, 256], strides = [1, 1]} : vector<6x256xf32> to vector<1x256xf32>
    %50 = vector.shape_cast %49 : vector<1x256xf32> to vector<256xf32>
    %51 = vector.shape_cast %50 : vector<256xf32> to vector<1x256xf32>
    %52 = vector.broadcast %51 : vector<1x256xf32> to vector<8x256xf32>
    %53 = arith.addf %48, %52 : vector<8x256xf32>
    %cst_22 = arith.constant 0.000000e+00 : f32
    %54 = vector.broadcast %cst_22 : f32 to vector<8x256xf32>
    %55 = arith.maximumf %53, %54 : vector<8x256xf32>
    %56 = arith.truncf %55 : vector<8x256xf32> to vector<8x256xbf16>
    %c4 = arith.constant 4 : index
    %c0_23 = arith.constant 0 : index
    %c0_24 = arith.constant 0 : index
    %57 = vector.load %arg3[%c4, %c0_23, %c0_24] : memref<5x256x256xbf16, #tpu.memory_space<vmem>>, vector<1x256x256xbf16>
    %58 = vector.shape_cast %57 : vector<1x256x256xbf16> to vector<256x256xbf16>
    %cst_25 = arith.constant dense<0.000000e+00> : vector<8x256xf32>
    %59 = tpu.matmul %56, %58, %cst_25 {dimension_numbers = #tpu.dot_dimension_numbers<[1], [0], [0], [1], [0, 0, 1, 1], [], []>} : vector<8x256xbf16>, vector<256x256xbf16>, vector<8x256xf32> -> vector<8x256xf32>
    %60 = vector.extract_strided_slice %0 {offsets = [5, 0], sizes = [1, 256], strides = [1, 1]} : vector<6x256xf32> to vector<1x256xf32>
    %61 = vector.shape_cast %60 : vector<1x256xf32> to vector<256xf32>
    %62 = vector.shape_cast %61 : vector<256xf32> to vector<1x256xf32>
    %63 = vector.broadcast %62 : vector<1x256xf32> to vector<8x256xf32>
    %64 = arith.addf %59, %63 : vector<8x256xf32>
    %cst_26 = arith.constant 0.000000e+00 : f32
    %65 = vector.broadcast %cst_26 : f32 to vector<8x256xf32>
    %66 = arith.maximumf %64, %65 : vector<8x256xf32>
    %67 = arith.truncf %66 : vector<8x256xf32> to vector<8x256xbf16>
    %c0_27 = arith.constant 0 : index
    %c0_28 = arith.constant 0 : index
    %68 = vector.load %arg4[%c0_27, %c0_28] : memref<256x128xbf16, #tpu.memory_space<vmem>>, vector<256x128xbf16>
    %cst_29 = arith.constant dense<0.000000e+00> : vector<8x128xf32>
    %69 = tpu.matmul %67, %68, %cst_29 {dimension_numbers = #tpu.dot_dimension_numbers<[1], [0], [0], [1], [0, 0, 1, 1], [], []>} : vector<8x256xbf16>, vector<256x128xbf16>, vector<8x128xf32> -> vector<8x128xf32>
    %c0_30 = arith.constant 0 : index
    %c0_31 = arith.constant 0 : index
    %70 = vector.load %arg6[%c0_30, %c0_31] : memref<1x128xf32, #tpu.memory_space<vmem>>, vector<1x128xf32>
    %71 = vector.broadcast %70 : vector<1x128xf32> to vector<8x128xf32>
    %72 = arith.addf %69, %71 : vector<8x128xf32>
    %c0_32 = arith.constant 0 : index
    %c0_33 = arith.constant 0 : index
    %73 = vector.load %arg7[%c0_32, %c0_33] : memref<8x128xf32, #tpu.memory_space<vmem>>, vector<8x128xf32>
    tpu.vector_store %arg7[%c0_32, %c0_33], %72 {strides = array<i32>} : memref<8x128xf32, #tpu.memory_space<vmem>>, vector<8x128xf32>,
    return
  }
  func.func @transform_0(%arg0: i32) -> (i32, i32) {
    %c0_i32 = arith.constant 0 : i32
    %c0_i32_0 = arith.constant 0 : i32
    return %arg0, %c0_i32 : i32, i32
  }
  func.func @transform_1(%arg0: i32) -> (i32, i32) {
    %c0_i32 = arith.constant 0 : i32
    %c0_i32_0 = arith.constant 0 : i32
    %c0_i32_1 = arith.constant 0 : i32
    return %c0_i32, %c0_i32_0 : i32, i32
  }
  func.func @transform_2(%arg0: i32) -> (i32, i32, i32) {
    %c0_i32 = arith.constant 0 : i32
    %c0_i32_0 = arith.constant 0 : i32
    %c0_i32_1 = arith.constant 0 : i32
    %c0_i32_2 = arith.constant 0 : i32
    return %c0_i32, %c0_i32_0, %c0_i32_1 : i32, i32, i32
  }
  func.func @transform_3(%arg0: i32) -> (i32, i32) {
    %c0_i32 = arith.constant 0 : i32
    %c0_i32_0 = arith.constant 0 : i32
    %c0_i32_1 = arith.constant 0 : i32
    return %c0_i32, %c0_i32_0 : i32, i32
  }
  func.func @transform_4(%arg0: i32) -> (i32, i32) {
    %c0_i32 = arith.constant 0 : i32
    %c0_i32_0 = arith.constant 0 : i32
    %c0_i32_1 = arith.constant 0 : i32
    return %c0_i32, %c0_i32_0 : i32, i32
  }
  func.func @transform_5(%arg0: i32) -> (i32, i32) {
    %c0_i32 = arith.constant 0 : i32
    %c0_i32_0 = arith.constant 0 : i32
    %c0_i32_1 = arith.constant 0 : i32
    return %c0_i32, %c0_i32_0 : i32, i32
  }
  func.func @transform_6(%arg0: i32) -> (i32, i32) {
    %c0_i32 = arith.constant 0 : i32
    %c0_i32_0 = arith.constant 0 : i32
    return %arg0, %c0_i32 : i32, i32
  }
}

</mosaic_0001>

<bundles_post_ra>
// kernel: tpu_custom_call.1
= control target key start
LH: loop header
LB: loop body
LE: loop exit
PB: predicated region body
PF: predicated region fallthrough
CT: control target
= control target key end

     0   :  { %11 = vsyncpa [#allocation3], 0  ;;  %s2395_s0 = inlined_call_operand.hbm [shape: f32[8,128], index: 0, kind: input, shape index: {}]   ;;  %s2396_s1 = inlined_call_operand.hbm [shape: bf16[128,256], index: 1, kind: input, shape index: {}]   ;;  %s2397_s2 = inlined_call_operand.hbm [shape: bf16[5,256,256], index: 2, kind: input, shape index: {}]   ;;  %s2398_s3 = inlined_call_operand.hbm [shape: bf16[256,128], index: 3, kind: input, shape index: {}]   ;;  %s2399_s4 = inlined_call_operand.hbm [shape: f32[6,256], index: 4, kind: input, shape index: {}]   ;;  %s2400_s5 = inlined_call_operand.vmem [shape: f32[1,128], index: 5, kind: input, shape index: {}]   ;;  %s2401_s6 = inlined_call_operand.hbm [shape: f32[8,128], index: 6, kind: output, shape index: {}]  }
   0x1   :  { %12 = vsyncpa [#allocation6], 0 }
   0x2   :  { %13 = vsyncpa [#allocation9], 0 }
   0x3   :  { %14 = vsyncpa [#allocation4], 0  ;;  %s2298_s21 = smov [#allocation5]  }
   0x4   :  { %s30_s22 = sshll.u32 %s2298_s21, 4  ;;  %s31_s22 = int_to_ptr.vmem [resolvable:$true] %s30_s22 }
   0x5   :  { %s2178_s23 = scalar_lea.vmem %s31_s22, 2048  ;;  %p2183_p1 = scmp.lt.s32.totalorder %s31_s22, %s31_s22 }
   0x6   :  { %p2179_p0 = scmp.ne.s32.totalorder %s31_s22, %s2178_s23  ;;  %p2184_p2 = scmp.lt.s32.totalorder %s2178_s23, %s2178_s23 }
   0x8   :  { %p2185_p3 = por %p2184_p2, %p2183_p1 }
   0xa   :  { %p2186_p4 = pnand %p2185_p3, %p2179_p0 }
   0xc   :  { %2189 = shalt.err (!%p2186_p4)
}
   0xd   :  { %s2299_s24 = smov 128   ;;  %s2300_s25 = smov 8  }
   0xe   :  { %36 = dma.hbm_to_vmem [thread:$0]  %s2396_s1, 2048, %s31_s22, [#allocation6], %s2299_s24, %s2299_s24, %s2300_s25  }
   0xf   :  { %s2301_s28 = smov [#allocation8]  }
  0x10   :  { %s54_s29 = sshll.u32 %s2301_s28, 4  ;;  %s55_s29 = int_to_ptr.vmem [resolvable:$true] %s54_s29 }
  0x11   :  { %s2198_s30 = scalar_lea.vmem %s55_s29, 2048  ;;  %p2203_p6 = scmp.lt.s32.totalorder %s55_s29, %s55_s29 }
  0x12   :  { %p2199_p5 = scmp.ne.s32.totalorder %s55_s29, %s2198_s30  ;;  %p2204_p7 = scmp.lt.s32.totalorder %s2198_s30, %s2198_s30 }
  0x14   :  { %p2205_p8 = por %p2204_p7, %p2203_p6 }
  0x16   :  { %p2206_p9 = pnand %p2205_p8, %p2199_p5 }
  0x18   :  { %2209 = shalt.err (!%p2206_p9)
}
  0x19   :  { %s2302_s7 = smov 64   ;;  %s2303_s8 = smov 4  }
  0x1a   :  { %60 = dma.hbm_to_vmem [thread:$0]  %s2398_s3, 2048, %s55_s29, [#allocation9], %s2302_s7, %s2302_s7, %s2303_s8  }
  0x1b   :  { %s2304_s11 = smov [#allocation2]   ;;  %s2305_s13 = smov [#allocation7]  }
  0x1c   :  { %s21_s12 = sshll.u32 %s2304_s11, 4  ;;  %s42_s1 = sshll.u32 %s2305_s13, 4  ;;  %s22_s12 = int_to_ptr.vmem [resolvable:$true] %s21_s12  ;;  %s43_s1 = int_to_ptr.vmem [resolvable:$true] %s42_s1 }
  0x1d   :  { %s2218_s14 = scalar_lea.vmem %s22_s12, 128  ;;  %p2223_p11 = scmp.lt.s32.totalorder %s22_s12, %s22_s12 }
  0x1e   :  { %p2219_p10 = scmp.ne.s32.totalorder %s22_s12, %s2218_s14  ;;  %p2224_p12 = scmp.lt.s32.totalorder %s2218_s14, %s2218_s14 }
  0x20   :  { %p2225_p13 = por %p2224_p12, %p2223_p11 }
  0x22   :  { %p2226_p0 = pnand %p2225_p13, %p2219_p10 }
  0x24   :  { %2229 = shalt.err (!%p2226_p0)
}
  0x25   :  { %24 = dma.hbm_to_vmem [thread:$0]  %s2395_s0, 128, %s22_s12, [#allocation3]  }
  0x26   :  { %s2238_s17 = scalar_lea.vmem %s43_s1, 20480  ;;  %p2243_p2 = scmp.lt.s32.totalorder %s43_s1, %s43_s1 }
  0x27   :  { %p2239_p1 = scmp.ne.s32.totalorder %s43_s1, %s2238_s17  ;;  %p2244_p3 = scmp.lt.s32.totalorder %s2238_s17, %s2238_s17 }
  0x29   :  { %p2245_p4 = por %p2244_p3, %p2243_p2 }
  0x2b   :  { %p2246_p5 = pnand %p2245_p4, %p2239_p1 }
  0x2d   :  { %2249 = shalt.err (!%p2246_p5)
}
  0x2e   :  { %48 = dma.hbm_to_vmem [thread:$0]  %s2397_s2, 20480, %s43_s1, [#allocation6], %s2299_s24, %s2299_s24, %s2300_s25  }
  0x2f   :  { %s2306_s19 = smov [#allocation10]  }
  0x30   :  { %s67_s20 = sshll.u32 %s2306_s19, 4  ;;  %s68_s20 = int_to_ptr.vmem [resolvable:$true] %s67_s20 }
  0x31   :  { %s2258_s21 = scalar_lea.vmem %s68_s20, 256  ;;  %p2263_p7 = scmp.lt.s32.totalorder %s68_s20, %s68_s20 }
  0x32   :  { %p2259_p6 = scmp.ne.s32.totalorder %s68_s20, %s2258_s21  ;;  %p2264_p8 = scmp.lt.s32.totalorder %s2258_s21, %s2258_s21 }
  0x34   :  { %p2265_p9 = por %p2264_p8, %p2263_p7 }
  0x36   :  { %p2266_p10 = pnand %p2265_p9, %p2259_p6 }
  0x38   :  { %2269 = shalt.err (!%p2266_p10)
}
  0x39   :  { %70 = dma.hbm_to_vmem [thread:$0]  %s2399_s4, 256, %s68_s20, [#allocation9]  }
  0x3a   :  { %2290 = dma.done.wait [#allocation3], 128  }
  0x3b   :  { %2291 = vsyncadd [#allocation3], 4294967168 }
  0x3c   :  { %2292 = dma.done.wait [#allocation6], 22528  }
  0x3d   :  { %2293 = vsyncadd [#allocation6], 4294944768 }
  0x3e   :  { %2294 = dma.done.wait [#allocation9], 2304  }
  0x3f   :  { %2295 = vsyncadd [#allocation9], 4294964992  ;;  %v2307_v0 = vmov 0   ;;  %v1890_v1 = vld [vmem:[#allocation5 + $0x74] ss:$8 sps:$4 sm:$0xff]   ;;  %s2308_s23 = smov [#allocation11]  }
  0x40   :  { %229 = vmatprep.mubr.bf16.mxu0 %v2307_v0  ;;  %v1892_v2 = vld [vmem:[#allocation5 + $0x70] ss:$8 sps:$4 sm:$0xff]   ;;  %197 = vmatprep.subr.bf16.mxu0 %v1890_v1  ;;  %v1893_v3 = vld [vmem:[#allocation5 + $0x64] ss:$8 sps:$4 sm:$0xff]   ;;  %v1895_v4 = vld [vmem:[#allocation5 + $0x60] ss:$8 sps:$4 sm:$0xff]  }
  0x41   :  { %198 = vmatpush1.bf16.msra.mxu0 %v1892_v2  ;;  %v1896_v5 = vld [vmem:[#allocation5 + $0x54] ss:$8 sps:$4 sm:$0xff]   ;;  %v1898_v6 = vld [vmem:[#allocation5 + $0x50] ss:$8 sps:$4 sm:$0xff]   ;;  %v1899_v7 = vld [vmem:[#allocation5 + $0x44] ss:$8 sps:$4 sm:$0xff]  }
  0x42   :  { %199 = vmatprep.subr.bf16.mxu0 %v1893_v3  ;;  %v1901_v8 = vld [vmem:[#allocation5 + $0x40] ss:$8 sps:$4 sm:$0xff]   ;;  %v1902_v9 = vld [vmem:[#allocation5 + $0x34] ss:$8 sps:$4 sm:$0xff]   ;;  %v1916_v11 = vld [vmem:[#allocation7 + $0x70] ss:$8 sps:$4 sm:$0xff]  }
  0x43   :  { %v1914_v10 = vld [vmem:[#allocation7 + $0x74] ss:$8 sps:$4 sm:$0xff]   ;;  %v1917_v12 = vld [vmem:[#allocation7 + $0x64] ss:$8 sps:$4 sm:$0xff]   ;;  %v1904_v13 = vld [vmem:[#allocation5 + $0x30] ss:$8 sps:$4 sm:$0xff]  }
  0x44   :  { %442 = vmatprep.subr.bf16.mxu1 %v1914_v10  ;;  %v1919_v14 = vld [vmem:[#allocation7 + $0x60] ss:$8 sps:$4 sm:$0xff]   ;;  %v1920_v15 = vld [vmem:[#allocation7 + $0x54] ss:$8 sps:$4 sm:$0xff]   ;;  %v1905_v16 = vld [vmem:[#allocation5 + $0x24] ss:$8 sps:$4 sm:$0xff]  }
  0x45   :  { %200 = vmatpush1.bf16.msra.mxu0 %v1895_v4  ;;  %443 = vmatpush1.bf16.msra.mxu1 %v1916_v11  ;;  %v1907_v17 = vld [vmem:[#allocation5 + $0x20] ss:$8 sps:$4 sm:$0xff]   ;;  %v1922_v18 = vld [vmem:[#allocation7 + $0x50] ss:$8 sps:$4 sm:$0xff]   ;;  %v1923_v19 = vld [vmem:[#allocation7 + $0x44] ss:$8 sps:$4 sm:$0xff]  }
  0x46   :  { %201 = vmatprep.subr.bf16.mxu0 %v1896_v5  ;;  %444 = vmatprep.subr.bf16.mxu1 %v1917_v12  ;;  %v1908_v20 = vld [vmem:[#allocation5 + $0x14] ss:$8 sps:$4 sm:$0xff]   ;;  %v1910_v21 = vld [vmem:[#allocation5 + $0x10] ss:$8 sps:$4 sm:$0xff]   ;;  %v1925_v22 = vld [vmem:[#allocation7 + $0x40] ss:$8 sps:$4 sm:$0xff]  }
  0x47   :  { %v1926_v23 = vld [vmem:[#allocation7 + $0x34] ss:$8 sps:$4 sm:$0xff]   ;;  %v1911_v24 = vld [vmem:[#allocation5 + $0x4] ss:$8 sps:$4 sm:$0xff]   ;;  %v1913_v25 = vld [vmem:[#allocation5] ss:$8 sps:$4 sm:$0xff]  }
  0x48   :  { %v91_v26 = vld [vmem:[#allocation2] sm:$0xff]  ;;  %v1929_v28 = vld [vmem:[#allocation7 + $0x24] ss:$8 sps:$4 sm:$0xff]   ;;  %v1931_v29 = vld [vmem:[#allocation7 + $0x20] ss:$8 sps:$4 sm:$0xff]   ;;  %s1653_s24 = sshll.u32 %s2308_s23, 4  ;;  %s1654_s24 = int_to_ptr.vmem [resolvable:$true] %s1653_s24 }
  0x49   :  { %202 = vmatpush1.bf16.msra.mxu0 %v1898_v6  ;;  %445 = vmatpush1.bf16.msra.mxu1 %v1919_v14  ;;  %v1928_v27 = vld [vmem:[#allocation7 + $0x30] ss:$8 sps:$4 sm:$0xff]   ;;  %v1932_v30 = vld [vmem:[#allocation7 + $0x14] ss:$8 sps:$4 sm:$0xff]   ;;  %v92_v31 = vpack.c.bf16 %v91_v26, %v91_v26  ;;  %v1935_v33 = vld [vmem:[#allocation7 + $0x4] ss:$8 sps:$4 sm:$0xff]   ;;  %p2275_p12 = scmp.lt.s32.totalorder %s1654_s24, %s1654_s24 }
  0x4a   :  { %203 = vmatprep.subr.bf16.mxu0 %v1899_v7  ;;  %446 = vmatprep.subr.bf16.mxu1 %v1920_v15  ;;  %v1934_v32 = vld [vmem:[#allocation7 + $0x10] ss:$8 sps:$4 sm:$0xff]   ;;  %v1937_v34 = vld [vmem:[#allocation7] ss:$8 sps:$4 sm:$0xff]   ;;  %v1938_v35 = vld [vmem:[#allocation7 + $0xf4] ss:$8 sps:$4 sm:$0xff]   ;;  %v109_v15 = vlaneseq }
  0x4b   :  { %v1940_v36 = vld [vmem:[#allocation7 + $0xf0] ss:$8 sps:$4 sm:$0xff]   ;;  %v1941_v37 = vld [vmem:[#allocation7 + $0xe4] ss:$8 sps:$4 sm:$0xff]   ;;  %v1943_v38 = vld [vmem:[#allocation7 + $0xe0] ss:$8 sps:$4 sm:$0xff]  }
  0x4c   :  { %v1944_v39 = vld [vmem:[#allocation7 + $0xd4] ss:$8 sps:$4 sm:$0xff]   ;;  %v1946_v40 = vld [vmem:[#allocation7 + $0xd0] ss:$8 sps:$4 sm:$0xff]   ;;  %v1947_v41 = vld [vmem:[#allocation7 + $0xc4] ss:$8 sps:$4 sm:$0xff]  }
  0x4d   :  { %204 = vmatpush1.bf16.msra.mxu0 %v1901_v8  ;;  %447 = vmatpush1.bf16.msra.mxu1 %v1922_v18  ;;  %v1949_v42 = vld [vmem:[#allocation7 + $0xc0] ss:$8 sps:$4 sm:$0xff]   ;;  %v1950_v43 = vld [vmem:[#allocation7 + $0xb4] ss:$8 sps:$4 sm:$0xff]   ;;  %v1952_v44 = vld [vmem:[#allocation7 + $0xb0] ss:$8 sps:$4 sm:$0xff]  }
  0x4e   :  { %205 = vmatprep.subr.bf16.mxu0 %v1902_v9  ;;  %448 = vmatprep.subr.bf16.mxu1 %v1923_v19  ;;  %v1953_v45 = vld [vmem:[#allocation7 + $0xa4] ss:$8 sps:$4 sm:$0xff]   ;;  %v1955_v46 = vld [vmem:[#allocation7 + $0xa0] ss:$8 sps:$4 sm:$0xff]   ;;  %v1956_v47 = vld [vmem:[#allocation7 + $0x94] ss:$8 sps:$4 sm:$0xff]  }
  0x4f   :  { %v1958_v48 = vld [vmem:[#allocation7 + $0x90] ss:$8 sps:$4 sm:$0xff]   ;;  %v1959_v49 = vld [vmem:[#allocation7 + $0x84] ss:$8 sps:$4 sm:$0xff]   ;;  %v1961_v50 = vld [vmem:[#allocation7 + $0x80] ss:$8 sps:$4 sm:$0xff]  }
  0x50   :  { %v1962_v51 = vld [vmem:[#allocation7 + $0x170] ss:$8 sps:$4 sm:$0xff]   ;;  %v1964_v52 = vld [vmem:[#allocation7 + $0x174] ss:$8 sps:$4 sm:$0xff]   ;;  %v1967_v53 = vld [vmem:[#allocation7 + $0x164] ss:$8 sps:$4 sm:$0xff]  }
  0x51   :  { %206 = vmatpush1.bf16.msra.mxu0 %v1904_v13  ;;  %449 = vmatpush1.bf16.msra.mxu1 %v1925_v22  ;;  %v1965_v54 = vld [vmem:[#allocation7 + $0x160] ss:$8 sps:$4 sm:$0xff]   ;;  %v1970_v55 = vld [vmem:[#allocation7 + $0x154] ss:$8 sps:$4 sm:$0xff]   ;;  %v1968_v56 = vld [vmem:[#allocation7 + $0x150] ss:$8 sps:$4 sm:$0xff]  }
  0x52   :  { %207 = vmatprep.subr.bf16.mxu0 %v1905_v16  ;;  %450 = vmatprep.subr.bf16.mxu1 %v1926_v23  ;;  %v1973_v57 = vld [vmem:[#allocation7 + $0x144] ss:$8 sps:$4 sm:$0xff]   ;;  %v1971_v58 = vld [vmem:[#allocation7 + $0x140] ss:$8 sps:$4 sm:$0xff]   ;;  %v1976_v59 = vld [vmem:[#allocation7 + $0x134] ss:$8 sps:$4 sm:$0xff]  }
  0x53   :  { %v1974_v60 = vld [vmem:[#allocation7 + $0x130] ss:$8 sps:$4 sm:$0xff]   ;;  %v1979_v61 = vld [vmem:[#allocation7 + $0x124] ss:$8 sps:$4 sm:$0xff]   ;;  %v1977_v62 = vld [vmem:[#allocation7 + $0x120] ss:$8 sps:$4 sm:$0xff]  }
  0x54   :  { %v1982_v63 = vld [vmem:[#allocation7 + $0x114] ss:$8 sps:$4 sm:$0xff]   ;;  %v1980_v0 = vld [vmem:[#allocation7 + $0x110] ss:$8 sps:$4 sm:$0xff]   ;;  %v1985_v1 = vld [vmem:[#allocation7 + $0x104] ss:$8 sps:$4 sm:$0xff]  }
  0x55   :  { %208 = vmatpush1.bf16.msra.mxu0 %v1907_v17  ;;  %451 = vmatpush1.bf16.msra.mxu1 %v1928_v27  ;;  %v1983_v2 = vld [vmem:[#allocation7 + $0x100] ss:$8 sps:$4 sm:$0xff]   ;;  %v1988_v3 = vld [vmem:[#allocation7 + $0x1f4] ss:$8 sps:$4 sm:$0xff]   ;;  %v1986_v4 = vld [vmem:[#allocation7 + $0x1f0] ss:$8 sps:$4 sm:$0xff]  }
  0x56   :  { %209 = vmatprep.subr.bf16.mxu0 %v1908_v20  ;;  %452 = vmatprep.subr.bf16.mxu1 %v1929_v28  ;;  %v1991_v5 = vld [vmem:[#allocation7 + $0x1e4] ss:$8 sps:$4 sm:$0xff]   ;;  %v1989_v6 = vld [vmem:[#allocation7 + $0x1e0] ss:$8 sps:$4 sm:$0xff]   ;;  %v1994_v7 = vld [vmem:[#allocation7 + $0x1d4] ss:$8 sps:$4 sm:$0xff]  }
  0x57   :  { %v1992_v8 = vld [vmem:[#allocation7 + $0x1d0] ss:$8 sps:$4 sm:$0xff]   ;;  %v1997_v9 = vld [vmem:[#allocation7 + $0x1c4] ss:$8 sps:$4 sm:$0xff]   ;;  %v1995_v10 = vld [vmem:[#allocation7 + $0x1c0] ss:$8 sps:$4 sm:$0xff]  }
  0x58   :  { %v2000_v11 = vld [vmem:[#allocation7 + $0x1b4] ss:$8 sps:$4 sm:$0xff]   ;;  %v1998_v12 = vld [vmem:[#allocation7 + $0x1b0] ss:$8 sps:$4 sm:$0xff]   ;;  %v2003_v13 = vld [vmem:[#allocation7 + $0x1a4] ss:$8 sps:$4 sm:$0xff]  }
  0x59   :  { %210 = vmatpush1.bf16.msra.mxu0 %v1910_v21  ;;  %453 = vmatpush1.bf16.msra.mxu1 %v1931_v29  ;;  %v2001_v14 = vld [vmem:[#allocation7 + $0x1a0] ss:$8 sps:$4 sm:$0xff]   ;;  %v2365_v16 = vshrl.u32 %v109_v15, 7  ;;  %v2057_v15 = vld [vmem:[#allocation7 + $0x284] ss:$8 sps:$4 sm:$0xff]   ;;  %s2270_s25 = scalar_lea.vmem %s1654_s24, 128 }
  0x5a   :  { %211 = vmatprep.subr.bf16.mxu0 %v1911_v24  ;;  %454 = vmatprep.subr.bf16.mxu1 %v1932_v30  ;;  %v2368_v18 = vld [vmem:[#allocation10] sm:$0x3f]  ;;  %v2370_v19 = vld [vmem:[#allocation10 + $0x8] sm:$0x3f]  ;;  %p2271_p11 = scmp.ne.s32.totalorder %s1654_s24, %s2270_s25  ;;  %p2276_p13 = scmp.lt.s32.totalorder %s2270_s25, %s2270_s25 }
  0x5b   :  { %v111_v17 = vsub.s32 0, %v2365_v16 }
  0x5c   :  { %p2277_p0 = por %p2276_p13, %p2275_p12 }
  0x5d   :  { %212 = vmatpush1.bf16.msra.mxu0 %v1913_v25  ;;  %455 = vmatpush1.bf16.msra.mxu1 %v1934_v32  ;;  %v112_v20 = vrot.slane %v2368_v18, %v111_v17  ;;  %v116_v21 = vrot.slane %v2370_v19, %v111_v17  ;;  %v2006_v32 = vld [vmem:[#allocation7 + $0x194] ss:$8 sps:$4 sm:$0xff]   ;;  %v2055_v17 = vld [vmem:[#allocation7 + $0x280] ss:$8 sps:$4 sm:$0xff]  }
  0x5e   :  { %456 = vmatprep.subr.bf16.mxu1 %v1935_v33  ;;  %688 = vmatprep.subr.bf16.mxu0 %v1964_v52  ;;  %v2004_v33 = vld [vmem:[#allocation7 + $0x190] ss:$8 sps:$4 sm:$0xff]   ;;  %v2036_v52 = vld [vmem:[#allocation7 + $0x2f4] ss:$8 sps:$4 sm:$0xff]   ;;  %p2278_p1 = pnand %p2277_p0, %p2271_p11 }
  0x60   :  { %230 = vmatmul.mubr.bf16.vlgmr.msra.gmra.mxu0 %v92_v31 }
  0x61   :  { %457 = vmatpush1.bf16.msra.mxu1 %v1937_v34  ;;  %689 = vmatpush1.bf16.msra.mxu0 %v1962_v51  ;;  %v2009_v34 = vld [vmem:[#allocation7 + $0x184] ss:$8 sps:$4 sm:$0xff]   ;;  %v2031_v51 = vld [vmem:[#allocation7 + $0x200] ss:$8 sps:$4 sm:$0xff]  }
  0x62   :  { %458 = vmatprep.subr.bf16.mxu1 %v1938_v35  ;;  %690 = vmatprep.subr.bf16.mxu0 %v1967_v53  ;;  %v2007_v35 = vld [vmem:[#allocation7 + $0x180] ss:$8 sps:$4 sm:$0xff]   ;;  %v2034_v53 = vld [vmem:[#allocation7 + $0x2f0] ss:$8 sps:$4 sm:$0xff]  }
  0x65   :  { %459 = vmatpush2.bf16.msra.mxu1 %v1940_v36  ;;  %691 = vmatpush1.bf16.msra.mxu0 %v1965_v54  ;;  %v2010_v36 = vld [vmem:[#allocation7 + $0x270] ss:$8 sps:$4 sm:$0xff]   ;;  %v2039_v54 = vld [vmem:[#allocation7 + $0x2e4] ss:$8 sps:$4 sm:$0xff]  }
  0x66   :  { %460 = vmatprep.subr.bf16.mxu1 %v1941_v37  ;;  %692 = vmatprep.subr.bf16.mxu0 %v1970_v55  ;;  %v2012_v37 = vld [vmem:[#allocation7 + $0x274] ss:$8 sps:$4 sm:$0xff]   ;;  %v2037_v55 = vld [vmem:[#allocation7 + $0x2e0] ss:$8 sps:$4 sm:$0xff]  }
  0x69   :  { %461 = vmatpush2.bf16.msra.mxu1 %v1943_v38  ;;  %693 = vmatpush1.bf16.msra.mxu0 %v1968_v56  ;;  %v2015_v38 = vld [vmem:[#allocation7 + $0x264] ss:$8 sps:$4 sm:$0xff]   ;;  %v2042_v56 = vld [vmem:[#allocation7 + $0x2d4] ss:$8 sps:$4 sm:$0xff]  }
  0x6a   :  { %462 = vmatprep.subr.bf16.mxu1 %v1944_v39  ;;  %694 = vmatprep.subr.bf16.mxu0 %v1973_v57  ;;  %v2013_v39 = vld [vmem:[#allocation7 + $0x260] ss:$8 sps:$4 sm:$0xff]   ;;  %v2040_v57 = vld [vmem:[#allocation7 + $0x2d0] ss:$8 sps:$4 sm:$0xff]  }
  0x6d   :  { %463 = vmatpush2.bf16.msra.mxu1 %v1946_v40  ;;  %695 = vmatpush1.bf16.msra.mxu0 %v1971_v58  ;;  %v2018_v40 = vld [vmem:[#allocation7 + $0x254] ss:$8 sps:$4 sm:$0xff]   ;;  %v2045_v58 = vld [vmem:[#allocation7 + $0x2c4] ss:$8 sps:$4 sm:$0xff]  }
  0x6e   :  { %464 = vmatprep.subr.bf16.mxu1 %v1947_v41  ;;  %696 = vmatprep.subr.bf16.mxu0 %v1976_v59  ;;  %v2016_v41 = vld [vmem:[#allocation7 + $0x250] ss:$8 sps:$4 sm:$0xff]   ;;  %v2043_v59 = vld [vmem:[#allocation7 + $0x2c0] ss:$8 sps:$4 sm:$0xff]  }
  0x71   :  { %465 = vmatpush2.bf16.msra.mxu1 %v1949_v42  ;;  %697 = vmatpush1.bf16.msra.mxu0 %v1974_v60  ;;  %v2021_v42 = vld [vmem:[#allocation7 + $0x244] ss:$8 sps:$4 sm:$0xff]   ;;  %v2048_v60 = vld [vmem:[#allocation7 + $0x2b4] ss:$8 sps:$4 sm:$0xff]  }
  0x72   :  { %466 = vmatprep.subr.bf16.mxu1 %v1950_v43  ;;  %698 = vmatprep.subr.bf16.mxu0 %v1979_v61  ;;  %v2019_v43 = vld [vmem:[#allocation7 + $0x240] ss:$8 sps:$4 sm:$0xff]   ;;  %v2046_v61 = vld [vmem:[#allocation7 + $0x2b0] ss:$8 sps:$4 sm:$0xff]  }
  0x75   :  { %467 = vmatpush2.bf16.msra.mxu1 %v1952_v44  ;;  %699 = vmatpush1.bf16.msra.mxu0 %v1977_v62  ;;  %v2024_v44 = vld [vmem:[#allocation7 + $0x234] ss:$8 sps:$4 sm:$0xff]   ;;  %v2051_v62 = vld [vmem:[#allocation7 + $0x2a4] ss:$8 sps:$4 sm:$0xff]  }
  0x76   :  { %468 = vmatprep.subr.bf16.mxu1 %v1953_v45  ;;  %700 = vmatprep.subr.bf16.mxu0 %v1982_v63  ;;  %v2022_v45 = vld [vmem:[#allocation7 + $0x230] ss:$8 sps:$4 sm:$0xff]   ;;  %v2049_v63 = vld [vmem:[#allocation7 + $0x2a0] ss:$8 sps:$4 sm:$0xff]  }
  0x79   :  { %469 = vmatpush2.bf16.msra.mxu1 %v1955_v46  ;;  %701 = vmatpush1.bf16.msra.mxu0 %v1980_v0  ;;  %v2027_v46 = vld [vmem:[#allocation7 + $0x224] ss:$8 sps:$4 sm:$0xff]   ;;  %v276_v0 = vsub.s32 1, %v2365_v16 }
  0x7a   :  { %470 = vmatprep.subr.bf16.mxu1 %v1956_v47  ;;  %702 = vmatprep.subr.bf16.mxu0 %v1985_v1  ;;  %v2025_v47 = vld [vmem:[#allocation7 + $0x220] ss:$8 sps:$4 sm:$0xff]  }
  0x7b   :  { %v277_v1 = vrot.slane %v2368_v18, %v276_v0 }
  0x7d   :  { %471 = vmatpush2.bf16.msra.mxu1 %v1958_v48  ;;  %703 = vmatpush1.bf16.msra.mxu0 %v1983_v2  ;;  %v2030_v48 = vld [vmem:[#allocation7 + $0x214] ss:$8 sps:$4 sm:$0xff]   ;;  %v281_v2 = vrot.slane %v2370_v19, %v276_v0  ;;  %v2103_v0 = vld [vmem:[#allocation7 + $0x380] ss:$8 sps:$4 sm:$0xff]  }
  0x7e   :  { %472 = vmatprep.subr.bf16.mxu1 %v1959_v49  ;;  %704 = vmatprep.subr.bf16.mxu0 %v1988_v3  ;;  %v2028_v49 = vld [vmem:[#allocation7 + $0x210] ss:$8 sps:$4 sm:$0xff]  }
  0x81   :  { %473 = vmatpush2.bf16.msra.mxu1 %v1961_v50  ;;  %705 = vmatpush2.bf16.msra.mxu0 %v1986_v4  ;;  %v2033_v50 = vld [vmem:[#allocation7 + $0x204] ss:$8 sps:$4 sm:$0xff]  }
  0x82   :  { %706 = vmatprep.subr.bf16.mxu0 %v1991_v5  ;;  %934 = vmatprep.subr.bf16.mxu1 %v2012_v37  ;;  %v2082_v37 = vld [vmem:[#allocation7 + $0x3f0] ss:$8 sps:$4 sm:$0xff]  }
  0x85   :  { %707 = vmatpush2.bf16.msra.mxu0 %v1989_v6 }
  0x86   :  { %708 = vmatprep.subr.bf16.mxu0 %v1994_v7 }
  0x89   :  { %709 = vmatpush2.bf16.msra.mxu0 %v1992_v8 }
  0x8a   :  { %710 = vmatprep.subr.bf16.mxu0 %v1997_v9 }
  0x8d   :  { %711 = vmatpush2.bf16.msra.mxu0 %v1995_v10 }
  0x8e   :  { %712 = vmatprep.subr.bf16.mxu0 %v2000_v11 }
  0x91   :  { %713 = vmatpush2.bf16.msra.mxu0 %v1998_v12 }
  0x92   :  { %714 = vmatprep.subr.bf16.mxu0 %v2003_v13  ;;  %v2054_v13 = vld [vmem:[#allocation7 + $0x294] ss:$8 sps:$4 sm:$0xff]  }
  0x95   :  { %715 = vmatpush2.bf16.msra.mxu0 %v2001_v14  ;;  %v2052_v14 = vld [vmem:[#allocation7 + $0x290] ss:$8 sps:$4 sm:$0xff]  }
  0x96   :  { %716 = vmatprep.subr.bf16.mxu0 %v2006_v32  ;;  %v2078_v32 = vld [vmem:[#allocation7 + $0x314] ss:$8 sps:$4 sm:$0xff]  }
  0x99   :  { %717 = vmatpush2.bf16.msra.mxu0 %v2004_v33  ;;  %v2076_v33 = vld [vmem:[#allocation7 + $0x310] ss:$8 sps:$4 sm:$0xff]  }
  0x9a   :  { %718 = vmatprep.subr.bf16.mxu0 %v2009_v34  ;;  %v2081_v34 = vld [vmem:[#allocation7 + $0x304] ss:$8 sps:$4 sm:$0xff]  }
  0x9d   :  { %719 = vmatpush2.bf16.msra.mxu0 %v2007_v35  ;;  %v2079_v35 = vld [vmem:[#allocation7 + $0x300] ss:$8 sps:$4 sm:$0xff]  }
 0x120   :  { %v231_v22 = vpop.f32.mrf.mxu0 }
 0x121   :  { %v232_v23 = vadd.f32 %v231_v22, %v112_v20  ;;  %v2058_v20 = vld [vmem:[#allocation7 + $0x370] ss:$8 sps:$4 sm:$0xff]   ;;  %v2063_v22 = vld [vmem:[#allocation7 + $0x364] ss:$8 sps:$4 sm:$0xff]  }
 0x122   :  { %v233_v24 = vpop.f32.mrf.mxu0 }
 0x123   :  { %v234_v25 = vadd.f32 %v233_v24, %v116_v21  ;;  %v238_v26 = vmax.f32 %v232_v23, 0.0  ;;  %v2060_v21 = vld [vmem:[#allocation7 + $0x374] ss:$8 sps:$4 sm:$0xff]   ;;  %v2061_v23 = vld [vmem:[#allocation7 + $0x360] ss:$8 sps:$4 sm:$0xff]  }
 0x124   :  { %v235_v27 = vpop.f32.mrf.mxu0  ;;  %1180 = vmatprep.subr.bf16.mxu0 %v2060_v21  ;;  %v2066_v24 = vld [vmem:[#allocation7 + $0x354] ss:$8 sps:$4 sm:$0xff]   ;;  %v2130_v21 = vld [vmem:[#allocation7 + $0x4f0] ss:$8 sps:$4 sm:$0xff]  }
 0x125   :  { %v239_v28 = vmax.f32 %v234_v25, 0.0  ;;  %v240_v31 = vpack.c.bf16 %v238_v26, %v238_v26  ;;  %v2064_v25 = vld [vmem:[#allocation7 + $0x350] ss:$8 sps:$4 sm:$0xff]   ;;  %v2069_v26 = vld [vmem:[#allocation7 + $0x344] ss:$8 sps:$4 sm:$0xff]  }
 0x126   :  { %v236_v29 = vpop.f32.mrf.mxu0  ;;  %v2067_v27 = vld [vmem:[#allocation7 + $0x340] ss:$8 sps:$4 sm:$0xff]  }
 0x127   :  { %v241_v30 = vpack.c.bf16 %v239_v28, %v239_v28  ;;  %v2072_v28 = vld [vmem:[#allocation7 + $0x334] ss:$8 sps:$4 sm:$0xff]   ;;  %v2070_v29 = vld [vmem:[#allocation7 + $0x330] ss:$8 sps:$4 sm:$0xff]  }
 0x129   :  { %474 = vmatprep.mubr.bf16.mxu1 %v241_v30  ;;  %v2075_v30 = vld [vmem:[#allocation7 + $0x324] ss:$8 sps:$4 sm:$0xff]  }
 0x12a   :  { %475 = vmatmul.mubr.bf16.vlgmr.msra.gmra.mxu1 %v240_v31  ;;  %v2073_v31 = vld [vmem:[#allocation7 + $0x320] ss:$8 sps:$4 sm:$0xff]  }
 0x12b   :  { %935 = vmatpush1.bf16.msra.mxu1 %v2010_v36  ;;  %v2084_v36 = vld [vmem:[#allocation7 + $0x3f4] ss:$8 sps:$4 sm:$0xff]  }
 0x12c   :  { %936 = vmatprep.subr.bf16.mxu1 %v2015_v38  ;;  %v2087_v38 = vld [vmem:[#allocation7 + $0x3e4] ss:$8 sps:$4 sm:$0xff]  }
 0x12f   :  { %937 = vmatpush1.bf16.msra.mxu1 %v2013_v39  ;;  %v2085_v39 = vld [vmem:[#allocation7 + $0x3e0] ss:$8 sps:$4 sm:$0xff]  }
 0x130   :  { %938 = vmatprep.subr.bf16.mxu1 %v2018_v40  ;;  %v2090_v40 = vld [vmem:[#allocation7 + $0x3d4] ss:$8 sps:$4 sm:$0xff]  }
 0x133   :  { %939 = vmatpush1.bf16.msra.mxu1 %v2016_v41  ;;  %v2088_v41 = vld [vmem:[#allocation7 + $0x3d0] ss:$8 sps:$4 sm:$0xff]  }
 0x134   :  { %940 = vmatprep.subr.bf16.mxu1 %v2021_v42  ;;  %v2093_v42 = vld [vmem:[#allocation7 + $0x3c4] ss:$8 sps:$4 sm:$0xff]  }
 0x137   :  { %941 = vmatpush1.bf16.msra.mxu1 %v2019_v43  ;;  %v2091_v43 = vld [vmem:[#allocation7 + $0x3c0] ss:$8 sps:$4 sm:$0xff]  }
 0x138   :  { %942 = vmatprep.subr.bf16.mxu1 %v2024_v44  ;;  %v2096_v44 = vld [vmem:[#allocation7 + $0x3b4] ss:$8 sps:$4 sm:$0xff]  }
 0x13b   :  { %943 = vmatpush1.bf16.msra.mxu1 %v2022_v45  ;;  %v2094_v45 = vld [vmem:[#allocation7 + $0x3b0] ss:$8 sps:$4 sm:$0xff]  }
 0x13c   :  { %944 = vmatprep.subr.bf16.mxu1 %v2027_v46  ;;  %v2099_v46 = vld [vmem:[#allocation7 + $0x3a4] ss:$8 sps:$4 sm:$0xff]  }
 0x13f   :  { %945 = vmatpush1.bf16.msra.mxu1 %v2025_v47  ;;  %v2097_v47 = vld [vmem:[#allocation7 + $0x3a0] ss:$8 sps:$4 sm:$0xff]  }
 0x140   :  { %946 = vmatprep.subr.bf16.mxu1 %v2030_v48  ;;  %v522_v48 = vsub.s32 2, %v2365_v16 }
 0x143   :  { %947 = vmatpush1.bf16.msra.mxu1 %v2028_v49  ;;  %v523_v49 = vrot.slane %v2368_v18, %v522_v48 }
 0x144   :  { %948 = vmatprep.subr.bf16.mxu1 %v2033_v50  ;;  %v527_v50 = vrot.slane %v2370_v19, %v522_v48  ;;  %v2151_v48 = vld [vmem:[#allocation7 + $0x480] ss:$8 sps:$4 sm:$0xff]  }
 0x147   :  { %949 = vmatpush1.bf16.msra.mxu1 %v2031_v51 }
 0x148   :  { %950 = vmatprep.subr.bf16.mxu1 %v2036_v52 }
 0x14b   :  { %951 = vmatpush2.bf16.msra.mxu1 %v2034_v53 }
 0x14c   :  { %952 = vmatprep.subr.bf16.mxu1 %v2039_v54 }
 0x14f   :  { %953 = vmatpush2.bf16.msra.mxu1 %v2037_v55 }
 0x150   :  { %954 = vmatprep.subr.bf16.mxu1 %v2042_v56 }
 0x153   :  { %955 = vmatpush2.bf16.msra.mxu1 %v2040_v57 }
 0x154   :  { %956 = vmatprep.subr.bf16.mxu1 %v2045_v58 }
 0x157   :  { %957 = vmatpush2.bf16.msra.mxu1 %v2043_v59 }
 0x158   :  { %958 = vmatprep.subr.bf16.mxu1 %v2048_v60 }
 0x15b   :  { %959 = vmatpush2.bf16.msra.mxu1 %v2046_v61  ;;  %v2102_v61 = vld [vmem:[#allocation7 + $0x394] ss:$8 sps:$4 sm:$0xff]  }
 0x15c   :  { %960 = vmatprep.subr.bf16.mxu1 %v2051_v62  ;;  %v2100_v62 = vld [vmem:[#allocation7 + $0x390] ss:$8 sps:$4 sm:$0xff]  }
 0x15f   :  { %961 = vmatpush2.bf16.msra.mxu1 %v2049_v63  ;;  %v2105_v63 = vld [vmem:[#allocation7 + $0x384] ss:$8 sps:$4 sm:$0xff]  }
 0x160   :  { %962 = vmatprep.subr.bf16.mxu1 %v2054_v13  ;;  %v2126_v13 = vld [vmem:[#allocation7 + $0x414] ss:$8 sps:$4 sm:$0xff]  }
 0x163   :  { %963 = vmatpush2.bf16.msra.mxu1 %v2052_v14  ;;  %v2124_v14 = vld [vmem:[#allocation7 + $0x410] ss:$8 sps:$4 sm:$0xff]  }
 0x164   :  { %964 = vmatprep.subr.bf16.mxu1 %v2057_v15  ;;  %v2129_v15 = vld [vmem:[#allocation7 + $0x404] ss:$8 sps:$4 sm:$0xff]  }
 0x167   :  { %965 = vmatpush2.bf16.msra.mxu1 %v2055_v17  ;;  %v2127_v17 = vld [vmem:[#allocation7 + $0x400] ss:$8 sps:$4 sm:$0xff]  }
 0x1ea   :  { %v476_v3 = vpop.f32.mrf.mxu1 }
 0x1eb   :  { %v477_v4 = vadd.f32 %v476_v3, %v277_v1  ;;  %v2106_v1 = vld [vmem:[#allocation7 + $0x470] ss:$8 sps:$4 sm:$0xff]   ;;  %v2111_v3 = vld [vmem:[#allocation7 + $0x464] ss:$8 sps:$4 sm:$0xff]  }
 0x1ec   :  { %v478_v5 = vpop.f32.mrf.mxu1 }
 0x1ed   :  { %v479_v6 = vadd.f32 %v478_v5, %v281_v2  ;;  %v483_v7 = vmax.f32 %v477_v4, 0.0  ;;  %v2108_v2 = vld [vmem:[#allocation7 + $0x474] ss:$8 sps:$4 sm:$0xff]   ;;  %v2109_v4 = vld [vmem:[#allocation7 + $0x460] ss:$8 sps:$4 sm:$0xff]  }
 0x1ee   :  { %v480_v8 = vpop.f32.mrf.mxu1  ;;  %1426 = vmatprep.subr.bf16.mxu1 %v2108_v2  ;;  %v2114_v5 = vld [vmem:[#allocation7 + $0x454] ss:$8 sps:$4 sm:$0xff]  }
 0x1ef   :  { %v484_v9 = vmax.f32 %v479_v6, 0.0  ;;  %v485_v12 = vpack.c.bf16 %v483_v7, %v483_v7  ;;  %v2112_v6 = vld [vmem:[#allocation7 + $0x450] ss:$8 sps:$4 sm:$0xff]   ;;  %v2117_v7 = vld [vmem:[#allocation7 + $0x444] ss:$8 sps:$4 sm:$0xff]  }
 0x1f0   :  { %v481_v10 = vpop.f32.mrf.mxu1  ;;  %v2115_v8 = vld [vmem:[#allocation7 + $0x440] ss:$8 sps:$4 sm:$0xff]  }
 0x1f1   :  { %v486_v11 = vpack.c.bf16 %v484_v9, %v484_v9  ;;  %v2120_v9 = vld [vmem:[#allocation7 + $0x434] ss:$8 sps:$4 sm:$0xff]   ;;  %v2118_v10 = vld [vmem:[#allocation7 + $0x430] ss:$8 sps:$4 sm:$0xff]  }
 0x1f3   :  { %720 = vmatprep.mubr.bf16.mxu0 %v486_v11  ;;  %v2123_v11 = vld [vmem:[#allocation7 + $0x424] ss:$8 sps:$4 sm:$0xff]  }
 0x1f4   :  { %721 = vmatmul.mubr.bf16.vlgmr.msra.gmra.mxu0 %v485_v12  ;;  %v2121_v12 = vld [vmem:[#allocation7 + $0x420] ss:$8 sps:$4 sm:$0xff]  }
 0x1f5   :  { %1181 = vmatpush1.bf16.msra.mxu0 %v2058_v20  ;;  %v2132_v20 = vld [vmem:[#allocation7 + $0x4f4] ss:$8 sps:$4 sm:$0xff]  }
 0x1f6   :  { %1182 = vmatprep.subr.bf16.mxu0 %v2063_v22  ;;  %v2135_v22 = vld [vmem:[#allocation7 + $0x4e4] ss:$8 sps:$4 sm:$0xff]  }
 0x1f9   :  { %1183 = vmatpush1.bf16.msra.mxu0 %v2061_v23  ;;  %v2133_v23 = vld [vmem:[#allocation7 + $0x4e0] ss:$8 sps:$4 sm:$0xff]  }
 0x1fa   :  { %1184 = vmatprep.subr.bf16.mxu0 %v2066_v24  ;;  %v2138_v24 = vld [vmem:[#allocation7 + $0x4d4] ss:$8 sps:$4 sm:$0xff]  }
 0x1fd   :  { %1185 = vmatpush1.bf16.msra.mxu0 %v2064_v25  ;;  %v2136_v25 = vld [vmem:[#allocation7 + $0x4d0] ss:$8 sps:$4 sm:$0xff]  }
 0x1fe   :  { %1186 = vmatprep.subr.bf16.mxu0 %v2069_v26  ;;  %v2141_v26 = vld [vmem:[#allocation7 + $0x4c4] ss:$8 sps:$4 sm:$0xff]  }
 0x201   :  { %1187 = vmatpush1.bf16.msra.mxu0 %v2067_v27  ;;  %v2139_v27 = vld [vmem:[#allocation7 + $0x4c0] ss:$8 sps:$4 sm:$0xff]  }
 0x202   :  { %1188 = vmatprep.subr.bf16.mxu0 %v2072_v28  ;;  %v2144_v28 = vld [vmem:[#allocation7 + $0x4b4] ss:$8 sps:$4 sm:$0xff]  }
 0x205   :  { %1189 = vmatpush1.bf16.msra.mxu0 %v2070_v29  ;;  %v2142_v29 = vld [vmem:[#allocation7 + $0x4b0] ss:$8 sps:$4 sm:$0xff]  }
 0x206   :  { %1190 = vmatprep.subr.bf16.mxu0 %v2075_v30  ;;  %v2147_v30 = vld [vmem:[#allocation7 + $0x4a4] ss:$8 sps:$4 sm:$0xff]  }
 0x209   :  { %1191 = vmatpush1.bf16.msra.mxu0 %v2073_v31  ;;  %v2145_v31 = vld [vmem:[#allocation7 + $0x4a0] ss:$8 sps:$4 sm:$0xff]  }
 0x20a   :  { %1192 = vmatprep.subr.bf16.mxu0 %v2078_v32  ;;  %v768_v32 = vsub.s32 3, %v2365_v16 }
 0x20d   :  { %1193 = vmatpush1.bf16.msra.mxu0 %v2076_v33  ;;  %v769_v33 = vrot.slane %v2368_v18, %v768_v32 }
 0x20e   :  { %1194 = vmatprep.subr.bf16.mxu0 %v2081_v34  ;;  %v773_v34 = vrot.slane %v2370_v19, %v768_v32 }
 0x211   :  { %1195 = vmatpush1.bf16.msra.mxu0 %v2079_v35 }
 0x212   :  { %1196 = vmatprep.subr.bf16.mxu0 %v2084_v36 }
 0x215   :  { %1197 = vmatpush2.bf16.msra.mxu0 %v2082_v37 }
 0x216   :  { %1198 = vmatprep.subr.bf16.mxu0 %v2087_v38 }
 0x219   :  { %1199 = vmatpush2.bf16.msra.mxu0 %v2085_v39 }
 0x21a   :  { %1200 = vmatprep.subr.bf16.mxu0 %v2090_v40 }
 0x21d   :  { %1201 = vmatpush2.bf16.msra.mxu0 %v2088_v41 }
 0x21e   :  { %1202 = vmatprep.subr.bf16.mxu0 %v2093_v42 }
 0x221   :  { %1203 = vmatpush2.bf16.msra.mxu0 %v2091_v43 }
 0x222   :  { %1204 = vmatprep.subr.bf16.mxu0 %v2096_v44 }
 0x225   :  { %1205 = vmatpush2.bf16.msra.mxu0 %v2094_v45  ;;  %v2150_v45 = vld [vmem:[#allocation7 + $0x494] ss:$8 sps:$4 sm:$0xff]  }
 0x226   :  { %1206 = vmatprep.subr.bf16.mxu0 %v2099_v46  ;;  %v2148_v46 = vld [vmem:[#allocation7 + $0x490] ss:$8 sps:$4 sm:$0xff]  }
 0x229   :  { %1207 = vmatpush2.bf16.msra.mxu0 %v2097_v47  ;;  %v2153_v47 = vld [vmem:[#allocation7 + $0x484] ss:$8 sps:$4 sm:$0xff]  }
 0x22a   :  { %1208 = vmatprep.subr.bf16.mxu0 %v2102_v61  ;;  %v1014_v61 = vsub.s32 4, %v2365_v16 }
 0x22d   :  { %1209 = vmatpush2.bf16.msra.mxu0 %v2100_v62  ;;  %v1015_v62 = vrot.slane %v2368_v18, %v1014_v61 }
 0x22e   :  { %1210 = vmatprep.subr.bf16.mxu0 %v2105_v63  ;;  %v1019_v63 = vrot.slane %v2370_v19, %v1014_v61 }
 0x231   :  { %1211 = vmatpush2.bf16.msra.mxu0 %v2103_v0 }
 0x2b4   :  { %v722_v51 = vpop.f32.mrf.mxu0 }
 0x2b5   :  { %v723_v52 = vadd.f32 %v722_v51, %v523_v49  ;;  %v2154_v49 = vld [vmem:[#allocation8 + $0x78] sm:$0xff]   ;;  %v2156_v51 = vld [vmem:[#allocation8 + $0x70] sm:$0xff]  }
 0x2b6   :  { %v724_v53 = vpop.f32.mrf.mxu0  ;;  %1857 = vmatprep.subr.bf16.mxu0 %v2154_v49 }
 0x2b7   :  { %v725_v54 = vadd.f32 %v724_v53, %v527_v50  ;;  %v729_v55 = vmax.f32 %v723_v52, 0.0  ;;  %v2155_v50 = vld [vmem:[#allocation8 + $0x38] sm:$0xff]   ;;  %v2157_v52 = vld [vmem:[#allocation8 + $0x30] sm:$0xff]   ;;  %v2158_v53 = vld [vmem:[#allocation8 + $0x68] sm:$0xff]  }
 0x2b8   :  { %v726_v56 = vpop.f32.mrf.mxu0 }
 0x2b9   :  { %v730_v57 = vmax.f32 %v725_v54, 0.0  ;;  %v731_v60 = vpack.c.bf16 %v729_v55, %v729_v55  ;;  %v2159_v54 = vld [vmem:[#allocation8 + $0x28] sm:$0xff]   ;;  %v2160_v55 = vld [vmem:[#allocation8 + $0x60] sm:$0xff]  }
 0x2ba   :  { %v727_v58 = vpop.f32.mrf.mxu0  ;;  %v2161_v56 = vld [vmem:[#allocation8 + $0x20] sm:$0xff]  }
 0x2bb   :  { %v732_v59 = vpack.c.bf16 %v730_v57, %v730_v57  ;;  %v2162_v57 = vld [vmem:[#allocation8 + $0x58] sm:$0xff]  }
 0x2bc   :  { %v2163_v58 = vld [vmem:[#allocation8 + $0x18] sm:$0xff]  }
 0x2bd   :  { %966 = vmatprep.mubr.bf16.mxu1 %v732_v59  ;;  %v2164_v59 = vld [vmem:[#allocation8 + $0x50] sm:$0xff]  }
 0x2be   :  { %967 = vmatmul.mubr.bf16.vlgmr.msra.gmra.mxu1 %v731_v60  ;;  %v2165_v60 = vld [vmem:[#allocation8 + $0x10] sm:$0xff]  }
 0x2bf   :  { %1427 = vmatpush1.bf16.msra.mxu1 %v2106_v1 }
 0x2c0   :  { %1428 = vmatprep.subr.bf16.mxu1 %v2111_v3 }
 0x2c3   :  { %1429 = vmatpush1.bf16.msra.mxu1 %v2109_v4 }
 0x2c4   :  { %1430 = vmatprep.subr.bf16.mxu1 %v2114_v5 }
 0x2c7   :  { %1431 = vmatpush1.bf16.msra.mxu1 %v2112_v6 }
 0x2c8   :  { %1432 = vmatprep.subr.bf16.mxu1 %v2117_v7 }
 0x2cb   :  { %1433 = vmatpush1.bf16.msra.mxu1 %v2115_v8 }
 0x2cc   :  { %1434 = vmatprep.subr.bf16.mxu1 %v2120_v9 }
 0x2cf   :  { %1435 = vmatpush1.bf16.msra.mxu1 %v2118_v10  ;;  %v2166_v10 = vld [vmem:[#allocation8 + $0x48] sm:$0xff]  }
 0x2d0   :  { %1436 = vmatprep.subr.bf16.mxu1 %v2123_v11  ;;  %v2167_v11 = vld [vmem:[#allocation8 + $0x8] sm:$0xff]  }
 0x2d3   :  { %1437 = vmatpush1.bf16.msra.mxu1 %v2121_v12  ;;  %v2168_v12 = vld [vmem:[#allocation8 + $0x40] sm:$0xff]  }
 0x2d4   :  { %1438 = vmatprep.subr.bf16.mxu1 %v2126_v13  ;;  %v2169_v13 = vld [vmem:[#allocation8] sm:$0xff]  }
 0x2d7   :  { %1439 = vmatpush1.bf16.msra.mxu1 %v2124_v14  ;;  %v1260_v14 = vsub.s32 5, %v2365_v16  ;;  %v1840_v16 = vld [vmem:[%s2400_s5] ss:$0 sm:$0xff] }
 0x2d8   :  { %1440 = vmatprep.subr.bf16.mxu1 %v2129_v15 }
 0x2d9   :  { %v1261_v15 = vrot.slane %v2368_v18, %v1260_v14 }
 0x2db   :  { %1441 = vmatpush1.bf16.msra.mxu1 %v2127_v17  ;;  %v1265_v17 = vrot.slane %v2370_v19, %v1260_v14 }
 0x2dc   :  { %1442 = vmatprep.subr.bf16.mxu1 %v2132_v20 }
 0x2df   :  { %1443 = vmatpush2.bf16.msra.mxu1 %v2130_v21 }
 0x2e0   :  { %1444 = vmatprep.subr.bf16.mxu1 %v2135_v22 }
 0x2e3   :  { %1445 = vmatpush2.bf16.msra.mxu1 %v2133_v23 }
 0x2e4   :  { %1446 = vmatprep.subr.bf16.mxu1 %v2138_v24 }
 0x2e7   :  { %1447 = vmatpush2.bf16.msra.mxu1 %v2136_v25 }
 0x2e8   :  { %1448 = vmatprep.subr.bf16.mxu1 %v2141_v26 }
 0x2eb   :  { %1449 = vmatpush2.bf16.msra.mxu1 %v2139_v27 }
 0x2ec   :  { %1450 = vmatprep.subr.bf16.mxu1 %v2144_v28 }
 0x2ef   :  { %1451 = vmatpush2.bf16.msra.mxu1 %v2142_v29 }
 0x2f0   :  { %1452 = vmatprep.subr.bf16.mxu1 %v2147_v30 }
 0x2f3   :  { %1453 = vmatpush2.bf16.msra.mxu1 %v2145_v31 }
 0x2f4   :  { %1454 = vmatprep.subr.bf16.mxu1 %v2150_v45 }
 0x2f7   :  { %1455 = vmatpush2.bf16.msra.mxu1 %v2148_v46 }
 0x2f8   :  { %1456 = vmatprep.subr.bf16.mxu1 %v2153_v47 }
 0x2fb   :  { %1457 = vmatpush2.bf16.msra.mxu1 %v2151_v48 }
 0x37e   :  { %v968_v35 = vpop.f32.mrf.mxu1 }
 0x37f   :  { %v969_v36 = vadd.f32 %v968_v35, %v769_v33 }
 0x380   :  { %v970_v37 = vpop.f32.mrf.mxu1 }
 0x381   :  { %v971_v38 = vadd.f32 %v970_v37, %v773_v34  ;;  %v975_v39 = vmax.f32 %v969_v36, 0.0 }
 0x382   :  { %v972_v40 = vpop.f32.mrf.mxu1 }
 0x383   :  { %v976_v41 = vmax.f32 %v971_v38, 0.0  ;;  %v977_v44 = vpack.c.bf16 %v975_v39, %v975_v39 }
 0x384   :  { %v973_v42 = vpop.f32.mrf.mxu1 }
 0x385   :  { %v978_v43 = vpack.c.bf16 %v976_v41, %v976_v41 }
 0x387   :  { %1212 = vmatprep.mubr.bf16.mxu0 %v978_v43 }
 0x388   :  { %1213 = vmatmul.mubr.bf16.vlgmr.msra.gmra.mxu0 %v977_v44 }
 0x389   :  { %1858 = vmatpush3.bf16.msra.mxu0 %v2155_v50 }
 0x38a   :  { %1859 = vmatprep.subr.bf16.mxu0 %v2156_v51 }
 0x38d   :  { %1860 = vmatpush3.bf16.msra.mxu0 %v2157_v52 }
 0x38e   :  { %1861 = vmatprep.subr.bf16.mxu0 %v2158_v53 }
 0x391   :  { %1862 = vmatpush3.bf16.msra.mxu0 %v2159_v54 }
 0x392   :  { %1863 = vmatprep.subr.bf16.mxu0 %v2160_v55 }
 0x395   :  { %1864 = vmatpush3.bf16.msra.mxu0 %v2161_v56 }
 0x396   :  { %1865 = vmatprep.subr.bf16.mxu0 %v2162_v57 }
 0x399   :  { %1866 = vmatpush3.bf16.msra.mxu0 %v2163_v58 }
 0x39a   :  { %1867 = vmatprep.subr.bf16.mxu0 %v2164_v59 }
 0x39d   :  { %1868 = vmatpush3.bf16.msra.mxu0 %v2165_v60 }
 0x39e   :  { %1869 = vmatprep.subr.bf16.mxu0 %v2166_v10 }
 0x3a1   :  { %1870 = vmatpush3.bf16.msra.mxu0 %v2167_v11 }
 0x3a2   :  { %1871 = vmatprep.subr.bf16.mxu0 %v2168_v12 }
 0x3a5   :  { %1872 = vmatpush3.bf16.msra.mxu0 %v2169_v13 }
 0x448   :  { %v1214_v0 = vpop.f32.mrf.mxu0 }
 0x449   :  { %v1215_v1 = vadd.f32 %v1214_v0, %v1015_v62 }
 0x44a   :  { %v1216_v2 = vpop.f32.mrf.mxu0 }
 0x44b   :  { %v1217_v3 = vadd.f32 %v1216_v2, %v1019_v63  ;;  %v1221_v4 = vmax.f32 %v1215_v1, 0.0 }
 0x44c   :  { %v1218_v5 = vpop.f32.mrf.mxu0 }
 0x44d   :  { %v1222_v6 = vmax.f32 %v1217_v3, 0.0  ;;  %v1223_v9 = vpack.c.bf16 %v1221_v4, %v1221_v4 }
 0x44e   :  { %v1219_v7 = vpop.f32.mrf.mxu0 }
 0x44f   :  { %v1224_v8 = vpack.c.bf16 %v1222_v6, %v1222_v6 }
 0x451   :  { %1458 = vmatprep.mubr.bf16.mxu1 %v1224_v8 }
 0x452   :  { %1459 = vmatmul.mubr.bf16.vlgmr.msra.gmra.mxu1 %v1223_v9 }
 0x512   :  { %v1460_v20 = vpop.f32.mrf.mxu1 }
 0x513   :  { %v1461_v21 = vadd.f32 %v1460_v20, %v1261_v15 }
 0x514   :  { %v1462_v22 = vpop.f32.mrf.mxu1 }
 0x515   :  { %v1463_v23 = vadd.f32 %v1462_v22, %v1265_v17  ;;  %v1467_v24 = vmax.f32 %v1461_v21, 0.0 }
 0x516   :  { %v1464_v25 = vpop.f32.mrf.mxu1 }
 0x517   :  { %v1468_v26 = vmax.f32 %v1463_v23, 0.0  ;;  %v1469_v29 = vpack.c.bf16 %v1467_v24, %v1467_v24 }
 0x518   :  { %v1465_v27 = vpop.f32.mrf.mxu1 }
 0x519   :  { %v1470_v28 = vpack.c.bf16 %v1468_v26, %v1468_v26 }
 0x51b   :  { %1638 = vmatprep.mubr.bf16.mxu0 %v1470_v28 }
 0x51c   :  { %1639 = vmatmul.mubr.bf16.vlgmr.msra.gmra.mxu0 %v1469_v29 }
 0x5dc   :  { %v1873_v30 = vpop.f32.mrf.mxu0 }
 0x5de   :  { %v1874_v18 = vpop.f32.mrf.mxu0 }
 0x5df   :  { %v1875_v19 = vadd.f32 %v1874_v18, %v1873_v30 }
 0x5e0   :  { %v1876_v31 = vpop.f32.mrf.mxu0 }
 0x5e1   :  { %v1641_v32 = vadd.f32 %v1875_v19, %v1840_v16 }
 0x5e2   :  { %v1877_v33 = vpop.f32.mrf.mxu0 }
 0x5e3   :  { %1646 = vst [vmem:[#allocation11] sm:$0xff] %v1641_v32 }
 0x5e4   :  { %2281 = shalt.err (!%p2278_p1)
}
 0x5e5   :  { %1656 = dma.vmem_to_hbm [thread:$0]  %s1654_s24, 128, %s2401_s6, [#allocation4]  }
 0x5e6   :  { %2296 = dma.done.wait [#allocation4], 128  }
 0x5e7   :  { %2297 = vsyncadd [#allocation4], 4294967168 }
 0x5e8   :  { %1660 = vsyncpa [#allocation3], 1 }
 0x5e9   :  { %1661 = vsyncpa [#allocation6], 1 }
 0x5ea   :  { %1662 = vsyncpa [#allocation9], 1 }
 0x5eb   :  { %1663 = vsyncpa [#allocation4], 1 }

</bundles_post_ra>
